<compile_context>
chip_gen: v6e
topology: v6e:2x2x1
jax: 0.10.0
libtpu: 0.0.40
codegen_flags: <defaults>
</compile_context>

<pallas_src>
import functools

import jax
import jax.numpy as jnp
from jax.experimental import pallas as pl
from jax.experimental.pallas import tpu as pltpu


def _round_up(x, m):
    return (x + m - 1) // m * m


def critic_kernel(inp_ref, act_ref, w_ref, b_ref, out_ref, *, D, H, r1, r2, r3):
    H2 = 2 * H
    relu = lambda z: jnp.maximum(z, 0.0)
    bf16 = jnp.bfloat16

    # (B, D) f32 — lane concat of the two inputs.
    xa = jnp.concatenate([inp_ref[...], act_ref[...]], axis=1)

    # Static, sublane-aligned views into the packed bf16 weight slab.
    w1 = w_ref[:D, :]          # (D,  4H)  [Wbd | diag(signs)*Wbd]
    w2 = w_ref[r1:r2, :H2]     # (4H, 2H)  block-diag(W2^T, W2^T)
    w3 = w_ref[r2:r3, :H2]     # (2H, 2H)  block-diag(W3^T, W3^T)

    # Bias / head rows — every slice starts at lane 0 (no lane rotates).
    b1 = b_ref[0:1, :]         # (1, 4H)  [b1 | ba | b1 | ba]
    b2 = b_ref[1:2, :H2]       # (1, 2H)  [b2 | b2]
    b3 = b_ref[2:3, :H2]       # (1, 2H)  [b3 | b3]
    wv = b_ref[3:4, :H2]       # (1, 2H)  [0.5*wv | 0.5*wv]
    bv = b_ref[4:5, 0:1]       # (1, 1)   bv (counted once)

    # Both branches ride side-by-side along the lane axis; bf16 MXU operands,
    # f32 accumulation / bias / ReLU.
    h1 = relu(jnp.dot(xa.astype(bf16), w1,
                      preferred_element_type=jnp.float32) + b1)    # (B, 4H)
    h2 = relu(jnp.dot(h1.astype(bf16), w2,
                      preferred_element_type=jnp.float32) + b2)    # (B, 2H)
    h3 = relu(jnp.dot(h2.astype(bf16), w3,
                      preferred_element_type=jnp.float32) + b3)    # (B, 2H)

    # Linear head on VPU/XLU: 0.5*(V(x3) + V(y3)) with bv added once.
    v = jnp.sum(h3 * wv, axis=-1, keepdims=True) + bv              # (B, 1)
    out_ref[...] = v.astype(out_ref.dtype)


def prepare_params(params):
    """One-time packing / transposition (hoisted off the per-call hot path)."""
    H = params["b1"].shape[0]
    Din = params["w1"].shape[1]
    Dact = params["wa"].shape[1]
    if Din < 4 or Dact < 2:
        raise ValueError(
            "Critic sign flips assume input_dim >= 4 and action_dim >= 2 "
            f"(got input_dim={Din}, action_dim={Dact}).")
    if H % 8 != 0:
        raise ValueError(f"hidden_dim must be a multiple of 8 for slab packing, got {H}.")

    D = Din + Dact
    H2, H4 = 2 * H, 4 * H

    # Sign row for the flipped branch of the concatenated [inputs | actions].
    signs = jnp.ones((D,), jnp.float32)
    signs = signs.at[1].set(-1.0).at[3].set(-1.0).at[Din + 1].set(-1.0)

    # Branch-A block-diagonal layer-1 weight: (D, 2H).
    wbd = jnp.zeros((D, H2), jnp.float32)
    wbd = wbd.at[:Din, :H].set(params["w1"].T).at[Din:, H:].set(params["wa"].T)
    # Column-stacked layer-1 weight: sign flips folded into the second copy.
    w1big = jnp.concatenate([wbd, signs[:, None] * wbd], axis=1)        # (D, 4H)

    w2t = params["w2"].T                                                # (2H, H)
    w2big = jnp.zeros((H4, H2), jnp.float32)
    w2big = w2big.at[:H2, :H].set(w2t).at[H2:, H:].set(w2t)             # (4H, 2H)

    w3t = params["w3"].T                                                # (H, H)
    w3big = jnp.zeros((H2, H2), jnp.float32)
    w3big = w3big.at[:H, :H].set(w3t).at[H:, H:].set(w3t)               # (2H, 2H)

    # One bf16 weight slab; every block starts at a 16-sublane-aligned row,
    # all padded to 4H lanes.  Cuts weight DMAs 3 -> 1 and halves the bytes.
    r1 = _round_up(D, 16)
    r2 = r1 + H4
    r3 = r2 + H2
    wslab = jnp.zeros((r3, H4), jnp.float32)
    wslab = wslab.at[:D, :].set(w1big)
    wslab = wslab.at[r1:r2, :H2].set(w2big)
    wslab = wslab.at[r2:r3, :H2].set(w3big)
    wslab = wslab.astype(jnp.bfloat16)

    # f32 bias / head slab: one quantity per sublane row, all lane-0 aligned
    # (no lane-offset slices in the kernel).
    bslab = jnp.zeros((8, H4), jnp.float32)
    bslab = bslab.at[0, :].set(jnp.concatenate(
        [params["b1"], params["ba"], params["b1"], params["ba"]]))
    bslab = bslab.at[1, :H2].set(jnp.concatenate([params["b2"], params["b2"]]))
    bslab = bslab.at[2, :H2].set(jnp.concatenate([params["b3"], params["b3"]]))
    bslab = bslab.at[3, :H2].set(
        0.5 * jnp.concatenate([params["wv"][0], params["wv"][0]]))
    bslab = bslab.at[4, 0].set(params["bv"][0])   # bv NOT halved (bv/2 added twice)

    static = dict(D=D, H=H, r1=r1, r2=r2, r3=r3)
    return dict(wslab=wslab, bslab=bslab, static=static)


def critic_forward(prepared, inputs, actions):
    B = inputs.shape[0]
    kernel = functools.partial(critic_kernel, **prepared["static"])
    vmem = pl.BlockSpec(memory_space=pltpu.MemorySpace.VMEM)
    # B=8, H=32: everything fits VMEM trivially; grid-less single invocation.
    # TODO(synk): for large B, add a batch grid (TILE_B a large multiple of 8,
    # dimension_semantics=("parallel",) to use both v7x TensorCores) and a
    # lane-dense output layout; amortize further by batching timesteps and/or
    # co-packing twin/target critic weights along the lane axis.
    return pl.pallas_call(
        kernel,
        out_shape=jax.ShapeDtypeStruct((B, 1), jnp.float32),
        in_specs=[vmem] * 4,
        out_specs=vmem,
    )(inputs, actions, prepared["wslab"], prepared["bslab"])


def init_params(key, input_dim, action_dim, hidden_dim):
    ks = jax.random.split(key, 10)

    def lin_init(kw, kb, fan_in, fan_out):
        bound = 1.0 / jnp.sqrt(fan_in)
        w = jax.random.uniform(kw, (fan_out, fan_in), jnp.float32, -bound, bound)
        b = jax.random.uniform(kb, (fan_out,), jnp.float32, -bound, bound)
        return w, b

    w1, b1 = lin_init(ks[0], ks[1], input_dim, hidden_dim)
    wa, ba = lin_init(ks[2], ks[3], action_dim, hidden_dim)
    w2, b2 = lin_init(ks[4], ks[5], 2 * hidden_dim, hidden_dim)
    w3, b3 = lin_init(ks[6], ks[7], hidden_dim, hidden_dim)
    wv, bv = lin_init(ks[8], ks[9], hidden_dim, 1)
    return dict(w1=w1, b1=b1, wa=wa, ba=ba, w2=w2, b2=b2,
                w3=w3, b3=b3, wv=wv, bv=bv)


def critic_reference(params, inputs, actions):
    """Pure-JAX f32 reference mirroring the PyTorch forward exactly."""
    _inputs = inputs.at[:, 1].set(-inputs[:, 1]).at[:, 3].set(-inputs[:, 3])
    _actions = actions.at[:, 1].set(-actions[:, 1])

    def lin(x, w, b):
        return x @ w.T + b

    relu = jax.nn.relu
    x = relu(lin(inputs, params["w1"], params["b1"]))
    y = relu(lin(_inputs, params["w1"], params["b1"]))
    a = relu(lin(actions, params["wa"], params["ba"]))
    na = relu(lin(_actions, params["wa"], params["ba"]))
    x = relu(lin(jnp.concatenate([x, a], axis=1), params["w2"], params["b2"]))
    y = relu(lin(jnp.concatenate([y, na], axis=1), params["w2"], params["b2"]))
    x = relu(lin(x, params["w3"], params["b3"]))
    y = relu(lin(y, params["w3"], params["b3"]))
    return lin(x, params["wv"], params["bv"]) / 2 + lin(y, params["wv"], params["bv"]) / 2


if __name__ == "__main__":
    B, INPUT_DIM, ACTION_DIM, HIDDEN = 8, 8, 4, 32

    key = jax.random.PRNGKey(0)
    k_in, k_act, k_par = jax.random.split(key, 3)
    inputs = jax.random.normal(k_in, (B, INPUT_DIM), jnp.float32)
    actions = jax.random.normal(k_act, (B, ACTION_DIM), jnp.float32)
    params = init_params(k_par, INPUT_DIM, ACTION_DIM, HIDDEN)

    prepared = prepare_params(params)          # one-time packing, off hot path

    out = jax.block_until_ready(critic_forward(prepared, inputs, actions))
    ref = critic_reference(params, inputs, actions)

    assert out.shape == (B, 1), out.shape
    # bf16 MXU operands (f32 accumulation) => loosened tolerance vs f32 ref.
    max_err = float(jnp.max(jnp.abs(out - ref)))
    assert jnp.allclose(out, ref, atol=5e-2, rtol=5e-2), (max_err, out, ref)

    print("KERNEL_OK")
</pallas_src>

<mosaic_0001>
module attributes {stable_mosaic.version = 11 : i64} {
  func.func @critic_kernel(%arg0: memref<8x8xf32, #tpu.memory_space<vmem>>, %arg1: memref<8x4xf32, #tpu.memory_space<vmem>>, %arg2: memref<208x128xbf16, #tpu.memory_space<vmem>>, %arg3: memref<8x128xf32, #tpu.memory_space<vmem>>, %arg4: memref<8x1xf32, #tpu.memory_space<vmem>>) attributes {dimension_semantics = [], scalar_prefetch = 0 : i64, scratch_operands = 0 : i64, tpu.core_type = #tpu.core_type<tc>} {
    %c0 = arith.constant 0 : index
    %c0_0 = arith.constant 0 : index
    %0 = vector.load %arg0[%c0, %c0_0] : memref<8x8xf32, #tpu.memory_space<vmem>>, vector<8x8xf32>
    %c0_1 = arith.constant 0 : index
    %c0_2 = arith.constant 0 : index
    %1 = vector.load %arg1[%c0_1, %c0_2] : memref<8x4xf32, #tpu.memory_space<vmem>>, vector<8x4xf32>
    %2 = tpu.concatenate %0, %1 in 1 : vector<8x8xf32>, vector<8x4xf32> -> vector<8x12xf32>
    %c0_3 = arith.constant 0 : index
    %c0_4 = arith.constant 0 : index
    %3 = vector.load %arg2[%c0_3, %c0_4] : memref<208x128xbf16, #tpu.memory_space<vmem>>, vector<12x128xbf16>
    %c16 = arith.constant 16 : index
    %c0_5 = arith.constant 0 : index
    %4 = vector.load %arg2[%c16, %c0_5] : memref<208x128xbf16, #tpu.memory_space<vmem>>, vector<128x64xbf16>
    %c144 = arith.constant 144 : index
    %c0_6 = arith.constant 0 : index
    %5 = vector.load %arg2[%c144, %c0_6] : memref<208x128xbf16, #tpu.memory_space<vmem>>, vector<64x64xbf16>
    %c0_7 = arith.constant 0 : index
    %c0_8 = arith.constant 0 : index
    %6 = vector.load %arg3[%c0_7, %c0_8] : memref<8x128xf32, #tpu.memory_space<vmem>>, vector<1x128xf32>
    %c1 = arith.constant 1 : index
    %c0_9 = arith.constant 0 : index
    %7 = vector.load %arg3[%c1, %c0_9] : memref<8x128xf32, #tpu.memory_space<vmem>>, vector<1x64xf32>
    %c2 = arith.constant 2 : index
    %c0_10 = arith.constant 0 : index
    %8 = vector.load %arg3[%c2, %c0_10] : memref<8x128xf32, #tpu.memory_space<vmem>>, vector<1x64xf32>
    %c3 = arith.constant 3 : index
    %c0_11 = arith.constant 0 : index
    %9 = vector.load %arg3[%c3, %c0_11] : memref<8x128xf32, #tpu.memory_space<vmem>>, vector<1x64xf32>
    %c4 = arith.constant 4 : index
    %c0_12 = arith.constant 0 : index
    %10 = vector.load %arg3[%c4, %c0_12] : memref<8x128xf32, #tpu.memory_space<vmem>>, vector<1x1xf32>
    %11 = arith.truncf %2 : vector<8x12xf32> to vector<8x12xbf16>
    %cst = arith.constant dense<0.000000e+00> : vector<8x128xf32>
    %12 = tpu.matmul %11, %3, %cst {dimension_numbers = #tpu.dot_dimension_numbers<[1], [0], [0], [1], [0, 0, 1, 1], [], []>} : vector<8x12xbf16>, vector<12x128xbf16>, vector<8x128xf32> -> vector<8x128xf32>
    %13 = vector.broadcast %6 : vector<1x128xf32> to vector<8x128xf32>
    %14 = arith.addf %12, %13 : vector<8x128xf32>
    %cst_13 = arith.constant 0.000000e+00 : f32
    %15 = vector.broadcast %cst_13 : f32 to vector<8x128xf32>
    %16 = arith.maximumf %14, %15 : vector<8x128xf32>
    %17 = arith.truncf %16 : vector<8x128xf32> to vector<8x128xbf16>
    %cst_14 = arith.constant dense<0.000000e+00> : vector<8x64xf32>
    %18 = tpu.matmul %17, %4, %cst_14 {dimension_numbers = #tpu.dot_dimension_numbers<[1], [0], [0], [1], [0, 0, 1, 1], [], []>} : vector<8x128xbf16>, vector<128x64xbf16>, vector<8x64xf32> -> vector<8x64xf32>
    %19 = vector.broadcast %7 : vector<1x64xf32> to vector<8x64xf32>
    %20 = arith.addf %18, %19 : vector<8x64xf32>
    %cst_15 = arith.constant 0.000000e+00 : f32
    %21 = vector.broadcast %cst_15 : f32 to vector<8x64xf32>
    %22 = arith.maximumf %20, %21 : vector<8x64xf32>
    %23 = arith.truncf %22 : vector<8x64xf32> to vector<8x64xbf16>
    %cst_16 = arith.constant dense<0.000000e+00> : vector<8x64xf32>
    %24 = tpu.matmul %23, %5, %cst_16 {dimension_numbers = #tpu.dot_dimension_numbers<[1], [0], [0], [1], [0, 0, 1, 1], [], []>} : vector<8x64xbf16>, vector<64x64xbf16>, vector<8x64xf32> -> vector<8x64xf32>
    %25 = vector.broadcast %8 : vector<1x64xf32> to vector<8x64xf32>
    %26 = arith.addf %24, %25 : vector<8x64xf32>
    %cst_17 = arith.constant 0.000000e+00 : f32
    %27 = vector.broadcast %cst_17 : f32 to vector<8x64xf32>
    %28 = arith.maximumf %26, %27 : vector<8x64xf32>
    %29 = vector.broadcast %9 : vector<1x64xf32> to vector<8x64xf32>
    %30 = arith.mulf %28, %29 : vector<8x64xf32>
    %cst_18 = arith.constant dense<0.000000e+00> : vector<8xf32>
    %31 = vector.multi_reduction <add>, %30, %cst_18 [1] : vector<8x64xf32> to vector<8xf32>
    %32 = vector.shape_cast %31 : vector<8xf32> to vector<8x1xf32>
    %33 = vector.broadcast %10 : vector<1x1xf32> to vector<8x1xf32>
    %34 = arith.addf %32, %33 : vector<8x1xf32>
    %c0_19 = arith.constant 0 : index
    %c0_20 = arith.constant 0 : index
    %35 = vector.load %arg4[%c0_19, %c0_20] : memref<8x1xf32, #tpu.memory_space<vmem>>, vector<8x1xf32>
    tpu.vector_store %arg4[%c0_19, %c0_20], %34 {strides = array<i32>} : memref<8x1xf32, #tpu.memory_space<vmem>>, vector<8x1xf32>,
    return
  }
}

</mosaic_0001>

<bundles_post_ra>
// kernel: tpu_custom_call.1
= control target key start
LH: loop header
LB: loop body
LE: loop exit
PB: predicated region body
PF: predicated region fallthrough
CT: control target
= control target key end

     0   :  { %9 = vsyncpa [#allocation3], 0  ;;  %s433_s15 = smov [#allocation2]   ;;  %s494_s0 = inlined_call_operand.vmem [shape: f32[8,8], index: 0, kind: input, shape index: {}]   ;;  %s495_s1 = inlined_call_operand.vmem [shape: f32[8,4], index: 1, kind: input, shape index: {}]   ;;  %s496_s2 = inlined_call_operand.hbm [shape: bf16[208,128], index: 2, kind: input, shape index: {}]   ;;  %s497_s3 = inlined_call_operand.vmem [shape: f32[8,128], index: 3, kind: input, shape index: {}]   ;;  %s498_s4 = inlined_call_operand.vmem [shape: f32[8,1], index: 4, kind: output, shape index: {}]  }
   0x1   :  { %s19_s16 = sshll.u32 %s433_s15, 4  ;;  %s20_s16 = int_to_ptr.vmem [resolvable:$true] %s19_s16 }
   0x2   :  { %s419_s17 = scalar_lea.vmem %s20_s16, 1664  ;;  %p424_p1 = scmp.lt.s32.totalorder %s20_s16, %s20_s16 }
   0x3   :  { %p420_p0 = scmp.ne.s32.totalorder %s20_s16, %s419_s17  ;;  %p425_p2 = scmp.lt.s32.totalorder %s419_s17, %s419_s17 }
   0x5   :  { %p426_p3 = por %p425_p2, %p424_p1 }
   0x7   :  { %p427_p4 = pnand %p426_p3, %p420_p0 }
   0x9   :  { %430 = shalt.err (!%p427_p4)
}
   0xa   :  { %s434_s18 = smov 64   ;;  %s435_s19 = smov 4  }
   0xb   :  { %25 = dma.hbm_to_vmem [thread:$0]  %s496_s2, 1664, %s20_s16, [#allocation3], %s434_s18, %s434_s18, %s435_s19  }
   0xc   :  { %431 = dma.done.wait [#allocation3], 1664  }
   0xd   :  { %432 = vsyncadd [#allocation3], 4294965632  ;;  %v436_v0 = vmov 0.0   ;;  %vm437_vm0 = vmmov 0   ;;  %v33_v1 = vld [vmem:[%s495_s1] sm:$0xff]  ;;  %vm85_vm1 = vcmask 1045504  }
   0xe   :  { %354 = vmatprep.subr.bf16.mxu0 %v436_v0  ;;  %360 = vmatprep.subr.bf16.mxu1 %v436_v0  ;;  %s438_s24 = smov 8   ;;  %v398_v2 = vld [vmem:[#allocation2] sm:$0x3f]   ;;  %v400_v5 = vld [vmem:[#allocation2 + $0x38] sm:$0xff]   ;;  %v401_v6 = vld [vmem:[#allocation2 + $0x30] sm:$0xff]   ;;  %vm38_vm2 = vcmask 64512  }
   0xf   :  { %356 = vmatprep.mubr.msk.bf16.mxu0 %vm437_vm0, %v436_v0  ;;  %376 = vmatprep.mubr.msk.bf16.mxu1 %vm437_vm0, %v436_v0  ;;  %v399_v3 = vld [vmem:[#allocation2 + $0x40] sm:$0xff]   ;;  %v87_v4 = vsel %vm85_vm1, %v398_v2, 0  ;;  %v402_v7 = vld [vmem:[#allocation2 + $0x28] sm:$0xff]   ;;  %v404_v9 = vld [vmem:[#allocation2 + $0x18] sm:$0xff]   ;;  %vm81_vm3 = vcmask 97280   ;;  %vm253_vm4 = vcmask 523264  }
  0x10   :  { %35 = vrot.lane.b32.xlu0 %v33_v1, %s438_s24  ;;  %355 = vmatpush3.bf16.msra.mxu0 %v87_v4  ;;  %v403_v8 = vld [vmem:[#allocation2 + $0x20] sm:$0xff]   ;;  %v405_v14 = vld [vmem:[#allocation2 + $0x10] sm:$0xff]   ;;  %v406_v15 = vld [vmem:[#allocation2 + $0x8] sm:$0xff]   ;;  %vm311_vm5 = vcmask 7168  }
  0x11   :  { %361 = vmatpush3.bf16.msra.mxu1 %v399_v3  ;;  %380 = vmatprep.subr.bf16.mxu0 %v436_v0  ;;  %v32_v10 = vld [vmem:[%s494_s0] sm:$0xff]  ;;  %v408_v17 = vld [vmem:[#allocation2 + $0x58] sm:$0xff]   ;;  %v409_v26 = vld [vmem:[#allocation2 + $0x50] sm:$0xff]  }
  0x12   :  { %362 = vmatprep.subr.bf16.mxu1 %v436_v0  ;;  %v407_v16 = vld [vmem:[#allocation2 + $0x60] sm:$0xff]   ;;  %v410_v27 = vld [vmem:[#allocation2 + $0x48] sm:$0xff]  }
  0x13   :  { %v318_v18 = vld [vmem:[%s497_s3] ss:$0 sm:$0xff]  ;;  %v321_v28 = vld [vmem:[%s497_s3 + $0x1] ss:$0 sm:$0xff]  ;;  %v330_v36 = vld [vmem:[%s497_s3 + $0x2] ss:$0 sm:$0xff] }
  0x14   :  { %v336_v40 = vld [vmem:[%s497_s3 + $0x3] ss:$0 sm:$0xff]  ;;  %v337_v46 = vld [vmem:[%s497_s3 + $0x4] ss:$0 sm:$0xff] }
  0x15   :  { %363 = vmatpush3.bf16.msra.mxu1 %v400_v5 }
  0x16   :  { %364 = vmatprep.subr.bf16.mxu1 %v436_v0 }
  0x19   :  { %365 = vmatpush3.bf16.msra.mxu1 %v401_v6 }
  0x1a   :  { %366 = vmatprep.subr.bf16.mxu1 %v436_v0 }
  0x1d   :  { %367 = vmatpush3.bf16.msra.mxu1 %v402_v7 }
  0x1e   :  { %368 = vmatprep.subr.bf16.mxu1 %v436_v0 }
  0x21   :  { %369 = vmatpush3.bf16.msra.mxu1 %v403_v8 }
  0x22   :  { %370 = vmatprep.subr.bf16.mxu1 %v436_v0 }
  0x25   :  { %371 = vmatpush3.bf16.msra.mxu1 %v404_v9 }
  0x26   :  { %372 = vmatprep.subr.bf16.mxu1 %v436_v0 }
  0x29   :  { %373 = vmatpush3.bf16.msra.mxu1 %v405_v14 }
  0x2a   :  { %374 = vmatprep.subr.bf16.mxu1 %v436_v0 }
  0x2d   :  { %375 = vmatpush3.bf16.msra.mxu1 %v406_v15 }
  0x82   :  { %v36_v11 = vpop.permute.xlu0 %35 }
  0x83   :  { %v39_v12 = vsel %vm38_vm2, %v32_v10, %v36_v11 }
  0x84   :  { %v71_v13 = vpack.c.bf16 %v39_v12, %v39_v12 }
  0x86   :  { %357 = vmatmul.mubr.msk.bf16.vlgmr.msra.gmra.mxu0 %vm81_vm3, %v71_v13 }
  0x87   :  { %388 = vmatprep.mubr.msk.bf16.mxu0 %vm437_vm0, %v436_v0  ;;  %381 = vmatpush3.bf16.msra.mxu0 %v407_v16 }
  0x88   :  { %382 = vmatprep.subr.bf16.mxu0 %v436_v0 }
  0x8b   :  { %383 = vmatpush3.bf16.msra.mxu0 %v408_v17 }
  0x8c   :  { %384 = vmatprep.subr.bf16.mxu0 %v436_v0 }
  0x8f   :  { %385 = vmatpush3.bf16.msra.mxu0 %v409_v26 }
  0x90   :  { %386 = vmatprep.subr.bf16.mxu0 %v436_v0 }
  0x93   :  { %387 = vmatpush3.bf16.msra.mxu0 %v410_v27 }
 0x146   :  { %v123_v19 = vpop.f32.mrf.mxu0 }
 0x147   :  { %v124_v20 = vadd.f32 %v318_v18, %v123_v19 }
 0x148   :  { %v358_v21 = vpop.f32.mrf.mxu0 }
 0x149   :  { %v129_v22 = vmax.f32 %v124_v20, 0.0 }
 0x14a   :  { %v126_v23 = vpop.f32.mrf.mxu0 }
 0x14b   :  { %v130_v24 = vpack.c.bf16 %v129_v22, %v129_v22 }
 0x14c   :  { %v359_v25 = vpop.f32.mrf.mxu0 }
 0x14d   :  { %377 = vmatmul.mubr.bf16.vlgmr.msra.gmra.mxu1 %v130_v24 }
 0x20d   :  { %v217_v29 = vpop.f32.mrf.mxu1 }
 0x20e   :  { %v218_v30 = vadd.f32 %v321_v28, %v217_v29 }
 0x20f   :  { %v378_v31 = vpop.f32.mrf.mxu1 }
 0x210   :  { %v223_v32 = vmax.f32 %v218_v30, 0.0 }
 0x211   :  { %v220_v33 = vpop.f32.mrf.mxu1 }
 0x212   :  { %v224_v34 = vpack.c.bf16 %v223_v32, %v223_v32 }
 0x213   :  { %v379_v35 = vpop.f32.mrf.mxu1 }
 0x214   :  { %389 = vmatmul.mubr.msk.bf16.vlgmr.msra.gmra.mxu0 %vm253_vm4, %v224_v34 }
 0x2d4   :  { %v291_v37 = vpop.f32.mrf.mxu0 }
 0x2d5   :  { %v292_v38 = vadd.f32 %v330_v36, %v291_v37 }
 0x2d6   :  { %v390_v39 = vpop.f32.mrf.mxu0 }
 0x2d7   :  { %v297_v41 = vmax.f32 %v292_v38, 0.0 }
 0x2d8   :  { %v294_v42 = vpop.f32.mrf.mxu0 }
 0x2d9   :  { %v302_v43 = vmul.f32 %v336_v40, %v297_v41 }
 0x2da   :  { %v391_v44 = vpop.f32.mrf.mxu0 }
 0x2db   :  { %v303_v45 = vsel %vm253_vm4, %v302_v43, 0.0 }
 0x2dc   :  { %304 = vadd.xlane.f32.xlu0 %v303_v45 }
 0x365   :  { %v305_v47 = vpop.xlane.xlu0 %304 }
 0x366   :  { %v310_v48 = vadd.f32 %v337_v46, %v305_v47 }
 0x368   :  { %312 = vst.msk [vmem:[%s498_s4] sm:$0xff] %vm311_vm5, %v310_v48 }
 0x369   :  { %317 = vsyncpa [#allocation3], 1 }

</bundles_post_ra>
